<compile_context>
chip_gen: v7x
topology: tpu7x:2x2x1
jax: 0.10.0
libtpu: 0.0.40
codegen_flags: <defaults>
</compile_context>

<pallas_src>
import functools

import jax
import jax.numpy as jnp
from jax import lax
from jax.experimental import pallas as pl
from jax.experimental.pallas import tpu as pltpu

PROJ_DIM = 32  # output dim of k_proj / q_proj in the PyTorch module


def _attention_kernel(x_ref, w_ref, b_ref, out_ref, *, B, Tq, Tk):
    # x_ref: (B*Tq + B*Tk, E)  -- q rows first, then k rows
    # w_ref: (E, 64) = [Wq^T | Wk^T]
    # b_ref: (1, 64) = [bq | bk]
    # out_ref: (B*Tq, Tk)      -- B diagonal blocks stacked along rows
    nq = B * Tq

    # One projection matmul for both Q and K (single MXU push).
    proj = jnp.dot(x_ref[...], w_ref[...],
                   preferred_element_type=jnp.float32) + b_ref[...]

    # Static slices: q rows take the Wq columns, k rows take the Wk columns.
    qp = proj[:nq, :PROJ_DIM]          # (B*Tq, 32)
    kp = proj[nq:, PROJ_DIM:]          # (B*Tk, 32)

    # Single score matmul: contraction on the last dim of both operands, so kp
    # stays in its natural (B*Tk, 32) layout (no explicit transpose / vxpose).
    scores = lax.dot_general(
        qp, kp,
        dimension_numbers=(((1,), (1,)), ((), ())),
        preferred_element_type=jnp.float32,
    )                                   # (B*Tq, B*Tk)

    # Extract the B diagonal (Tq, Tk) blocks (B is a small static constant ->
    # trace-time slices) and write the whole output slab with ONE store.
    blocks = [scores[b * Tq:(b + 1) * Tq, b * Tk:(b + 1) * Tk] for b in range(B)]
    out_ref[...] = jnp.concatenate(blocks, axis=0).astype(out_ref.dtype)


def prepare_params(wq, bq, wk, bk):
    """One-time weight packing hoisted out of the call path.

    PyTorch Linear params: W=(32, E), b=(32,).  Returns:
      w_pack: (E, 64) = [Wq^T | Wk^T]
      b_pack: (1, 64) = [bq | bk]
    """
    w_pack = jnp.concatenate(
        [jnp.asarray(wq, jnp.float32).T, jnp.asarray(wk, jnp.float32).T], axis=1)
    b_pack = jnp.concatenate(
        [jnp.asarray(bq, jnp.float32), jnp.asarray(bk, jnp.float32)]
    ).reshape(1, 2 * PROJ_DIM)
    return w_pack, b_pack


@jax.jit
def attention_forward(query, key, w_pack, b_pack):
    """query: (B, Tq, E), key: (B, Tk, E); w_pack: (E, 64); b_pack: (1, 64).
    Returns attn_weights: (B, Tq, Tk)."""
    B, Tq, E = query.shape
    Bk, Tk, Ek = key.shape
    assert B == Bk and E == Ek

    # Fold batch into the row dim and stack q / k rows into one operand so the
    # kernel sees 3 inputs total (activations, packed weight, packed bias).
    q2d = jnp.asarray(query, jnp.float32).reshape(B * Tq, E)
    k2d = jnp.asarray(key, jnp.float32).reshape(B * Tk, E)
    x = jnp.concatenate([q2d, k2d], axis=0)        # (B*(Tq+Tk), E)

    kernel = functools.partial(_attention_kernel, B=B, Tq=Tq, Tk=Tk)
    vmem = pl.BlockSpec(memory_space=pltpu.MemorySpace.VMEM)

    out2d = pl.pallas_call(
        kernel,
        out_shape=jax.ShapeDtypeStruct((B * Tq, Tk), jnp.float32),
        in_specs=[vmem, vmem, vmem],
        out_specs=vmem,
    )(x, w_pack, b_pack)

    # Free reshape in the jitted wrapper (row-major fold matches bmm semantics).
    return out2d.reshape(B, Tq, Tk)


if __name__ == "__main__":
    # Small shapes consistent with the module: B=2, seq=8, embed_dim=32
    B, Tq, Tk, E = 2, 8, 8, 32

    key0 = jax.random.PRNGKey(0)
    k1, k2, k3, k4, k5, k6 = jax.random.split(key0, 6)

    query = jax.random.normal(k1, (B, Tq, E), dtype=jnp.float32)
    key_in = jax.random.normal(k2, (B, Tk, E), dtype=jnp.float32)

    # PyTorch Linear-shaped params: W=(out,in)=(32,E), b=(out,)=(32,)
    wq = jax.random.normal(k3, (PROJ_DIM, E), dtype=jnp.float32) * 0.05
    bq = jax.random.normal(k4, (PROJ_DIM,), dtype=jnp.float32) * 0.05
    wk = jax.random.normal(k5, (PROJ_DIM, E), dtype=jnp.float32) * 0.05
    bk = jax.random.normal(k6, (PROJ_DIM,), dtype=jnp.float32) * 0.05

    # Hoisted weight packing (not in the per-call hot path).
    w_pack, b_pack = prepare_params(wq, bq, wk, bk)

    out = attention_forward(query, key_in, w_pack, b_pack)
    jax.block_until_ready(out)

    # Pure-JAX reference check
    qp_ref = jnp.einsum("bte,oe->bto", query, wq) + bq
    kp_ref = jnp.einsum("bse,oe->bso", key_in, wk) + bk
    ref = jnp.einsum("bto,bso->bts", qp_ref, kp_ref)
    assert out.shape == (B, Tq, Tk)
    assert jnp.allclose(out, ref, atol=1e-4, rtol=1e-4)

    print("KERNEL_OK")
</pallas_src>

<mosaic_0001>
module attributes {stable_mosaic.version = 11 : i64} {
  func.func @_attention_kernel(%arg0: memref<32x32xf32, #tpu.memory_space<vmem>>, %arg1: memref<32x64xf32, #tpu.memory_space<vmem>>, %arg2: memref<1x64xf32, #tpu.memory_space<vmem>>, %arg3: memref<16x8xf32, #tpu.memory_space<vmem>>) attributes {dimension_semantics = [], scalar_prefetch = 0 : i64, scratch_operands = 0 : i64, tpu.core_type = #tpu.core_type<tc>} {
    %c0 = arith.constant 0 : index
    %c0_0 = arith.constant 0 : index
    %0 = vector.load %arg0[%c0, %c0_0] : memref<32x32xf32, #tpu.memory_space<vmem>>, vector<32x32xf32>
    %c0_1 = arith.constant 0 : index
    %c0_2 = arith.constant 0 : index
    %1 = vector.load %arg1[%c0_1, %c0_2] : memref<32x64xf32, #tpu.memory_space<vmem>>, vector<32x64xf32>
    %cst = arith.constant dense<0.000000e+00> : vector<32x64xf32>
    %2 = tpu.matmul %0, %1, %cst {dimension_numbers = #tpu.dot_dimension_numbers<[1], [0], [0], [1], [0, 0, 1, 1], [], []>} : vector<32x32xf32>, vector<32x64xf32>, vector<32x64xf32> -> vector<32x64xf32>
    %c0_3 = arith.constant 0 : index
    %c0_4 = arith.constant 0 : index
    %3 = vector.load %arg2[%c0_3, %c0_4] : memref<1x64xf32, #tpu.memory_space<vmem>>, vector<1x64xf32>
    %4 = vector.broadcast %3 : vector<1x64xf32> to vector<32x64xf32>
    %5 = arith.addf %2, %4 : vector<32x64xf32>
    %6 = vector.extract_strided_slice %5 {offsets = [0, 0], sizes = [16, 32], strides = [1, 1]} : vector<32x64xf32> to vector<16x32xf32>
    %7 = vector.extract_strided_slice %5 {offsets = [16, 32], sizes = [16, 32], strides = [1, 1]} : vector<32x64xf32> to vector<16x32xf32>
    %cst_5 = arith.constant dense<0.000000e+00> : vector<16x16xf32>
    %8 = tpu.matmul %6, %7, %cst_5 {dimension_numbers = #tpu.dot_dimension_numbers<[1], [1], [0], [0], [0, 0, 1, 0], [], []>} : vector<16x32xf32>, vector<16x32xf32>, vector<16x16xf32> -> vector<16x16xf32>
    %9 = vector.extract_strided_slice %8 {offsets = [0, 0], sizes = [8, 8], strides = [1, 1]} : vector<16x16xf32> to vector<8x8xf32>
    %10 = vector.extract_strided_slice %8 {offsets = [8, 8], sizes = [8, 8], strides = [1, 1]} : vector<16x16xf32> to vector<8x8xf32>
    %11 = tpu.concatenate %9, %10 in 0 : vector<8x8xf32>, vector<8x8xf32> -> vector<16x8xf32>
    %c0_6 = arith.constant 0 : index
    %c0_7 = arith.constant 0 : index
    %12 = vector.load %arg3[%c0_6, %c0_7] : memref<16x8xf32, #tpu.memory_space<vmem>>, vector<16x8xf32>
    tpu.vector_store %arg3[%c0_6, %c0_7], %11 {strides = array<i32>} : memref<16x8xf32, #tpu.memory_space<vmem>>, vector<16x8xf32>,
    return
  }
}

</mosaic_0001>

<bundles_post_ra>
// kernel: attention_forward.1
= control target key start
LH: loop header
LB: loop body
LE: loop exit
PB: predicated region body
PF: predicated region fallthrough
CT: control target
= control target key end

     0   :  { %vm30_vm0 = vcmask 261120   ;;  %s404_s0 = inlined_call_operand.vmem [shape: f32[32,32], index: 0, kind: input, shape index: {}]   ;;  %s405_s1 = inlined_call_operand.vmem [shape: f32[32,64], index: 1, kind: input, shape index: {}]   ;;  %s406_s2 = inlined_call_operand.vmem [shape: f32[1,64], index: 2, kind: input, shape index: {}]   ;;  %s407_s3 = inlined_call_operand.hbm [shape: f32[16,8], index: 3, kind: output, shape index: {}]  }
   0x1   :  { %v19_v0 = vld [vmem:[%s405_s1] sm:$0xff]  ;;  %v20_v1 = vld [vmem:[%s405_s1 + $0x8] sm:$0xff]  ;;  %v21_v2 = vld [vmem:[%s405_s1 + $0x10] sm:$0xff] }
   0x2   :  { %v284_v3 = vpack.c.bf16 %v20_v1, %v19_v0  ;;  %v22_v4 = vld [vmem:[%s405_s1 + $0x18] sm:$0xff]  ;;  %v15_v5 = vld [vmem:[%s404_s0] sm:$0xff] }
   0x3   :  { %v288_v6 = vpack.c.bf16 %v22_v4, %v21_v2  ;;  %271 = vmatprep.mubr.msk.f32.mxu0 %vm30_vm0, %v15_v5 }
   0x4   :  { %8 = vsyncpa [#allocation3], 0  ;;  %285 = vmatprep.subr.bf16.mxu0 %v284_v3  ;;  %v16_v7 = vld [vmem:[%s404_s0 + $0x8] sm:$0xff]  ;;  %v17_v8 = vld [vmem:[%s404_s0 + $0x10] sm:$0xff]  ;;  %s332_s29 = smov 96   ;;  %vm223_vm2 = vcmask 64512  }
   0x5   :  { %287 = vmatpush3.bf16.msra.mxu0 %v284_v3  ;;  %v18_v9 = vld [vmem:[%s404_s0 + $0x18] sm:$0xff]  ;;  %v242_v10 = vld [vmem:[%s406_s2] ss:$0 sm:$0xff]  ;;  %vm293_vm1 = vmpackc.low %vm30_vm0, %vm30_vm0  ;;  %s333_s0 = smov 120   ;;  %s334_s2 = smov [#allocation2]  }
   0x6   :  { %289 = vmatprep.subr.bf16.mxu0 %v288_v6  ;;  %s231_s30 = sshll.u32 %s334_s2, 4  ;;  %s232_s30 = int_to_ptr.vmem [resolvable:$true] %s231_s30 }
   0x7   :  { %s308_s4 = scalar_lea.vmem %s232_s30, 256  ;;  %p313_p1 = scmp.lt.s32.totalorder %s232_s30, %s232_s30 }
   0x8   :  { %p309_p0 = scmp.ne.s32.totalorder %s232_s30, %s308_s4  ;;  %p314_p2 = scmp.lt.s32.totalorder %s308_s4, %s308_s4 }
   0x9   :  { %291 = vmatpush3.bf16.msra.mxu0 %v288_v6 }
   0xa   :  { %p315_p3 = por %p314_p2, %p313_p1 }
   0xc   :  { %272 = vmatmul.mubr.msk.f32.vlgmr.msra.gmra.mrb[0].mxu0 %vm30_vm0, %v16_v7  ;;  %p316_p4 = pnand %p315_p3, %p309_p0 }
   0xd   :  { %274 = vmatprep.mubr.msk.f32.mxu0 %vm30_vm0, %v17_v8 }
  0x10   :  { %275 = vmatmul.mubr.msk.f32.gmra.mrb[2].mxu0 %vm30_vm0, %v18_v9 }
  0xdf   :  { %v273_v11 = vpop.f32.mrb[0].mxu0 }
  0xe0   :  { %v115_v12 = vadd.f32 %v273_v11, %v242_v10  ;;  %v109_v13 = vpop.f32.mrb[1].mxu0 }
  0xe1   :  { %v110_v14 = vadd.f32 %v242_v10, %v109_v13 }
  0xe3   :  { %v276_v15 = vpop.f32.mrb[2].mxu0  ;;  %281 = vmatprep.mubr.msk.f32.mxu1 %vm30_vm0, %v110_v14 }
  0xe4   :  { %v125_v16 = vadd.f32 %v276_v15, %v242_v10  ;;  %v119_v17 = vpop.f32.mrb[3].mxu0 }
  0xe5   :  { %v120_v18 = vadd.f32 %v242_v10, %v119_v17 }
  0xe7   :  { %v303_v19 = vpack.i.bf16 %v125_v16, %v120_v18 }
  0xe9   :  { %304 = vrot.lane.b32.xlu0 %v303_v19, %s332_s29 }
 0x15b   :  { %v305_v20 = vpop.permute.xlu0 %304 }
 0x15c   :  { %v307_v21 = vunpack.i.h.bf16 %v305_v20  ;;  %v306_v22 = vunpack.i.l.bf16 %v305_v20 }
 0x15e   :  { %v292_v23 = vpack.c.bf16 %v307_v21, %v306_v22 }
 0x160   :  { %294 = vmatprep.subr.msk.bf16.mxu1 %vm293_vm1, %v292_v23 }
 0x161   :  { %297 = vmatpush3.bf16.xpose.msk.msra.mxu1 %vm293_vm1, %v292_v23 }
 0x168   :  { %282 = vmatmul.mubr.msk.f32.vlgmr.msra.gmra.mrb[0].mxu1 %vm30_vm0, %v115_v12 }
 0x23b   :  { %v283_v24 = vpop.f32.mrb[0].mxu1 }
 0x23c   :  { %220 = vrot.lane.b32.xlu0 %v283_v24, %s333_s0  ;;  %v210_v25 = vpop.f32.mrb[1].mxu1 }
 0x23d   :  { %224 = vst.msk [vmem:[#allocation2] sm:$0xff] %vm223_vm2, %v210_v25 }
 0x2ae   :  { %v221_v26 = vpop.permute.xlu0 %220 }
 0x2af   :  { %225 = vst.msk [vmem:[#allocation2 + $0x8] sm:$0xff] %vm223_vm2, %v221_v26 }
 0x2b0   :  { %319 = shalt.err (!%p316_p4)
}
 0x2b1   :  { %s320_s7 = scalar_lea.hbm %s407_s3, 256 }
 0x2b2   :  { %p321_p5 = scmp.ne.s32.totalorder %s407_s3, %s320_s7  ;;  %p324_p6 = scmp.lt.u32.totalorder %s320_s7, %s407_s3 }
 0x2b4   :  { %p326_p7 = pnand %p324_p6, %p321_p5 }
 0x2b6   :  { %329 = shalt.err (!%p326_p7)
}
 0x2b7   :  { %s335_s12 = smov 128   ;;  %s336_s13 = smov 8  }
 0x2b8   :  { %237 = dma.vmem_to_hbm [thread:$0]  %s232_s30, 256, %s407_s3, [#allocation3], %s335_s12, %s335_s12, %s336_s13  }
 0x2b9   :  { %330 = dma.done.wait [#allocation3], 256  }
 0x2ba   :  { %331 = vsyncadd [#allocation3], 4294967040 }
 0x2bb   :  { %241 = vsyncpa [#allocation3], 1 }

</bundles_post_ra>
